<compile_context>
chip_gen: v5e
topology: v5e:2x2
jax: 0.10.0
libtpu: 0.0.40
codegen_flags: <defaults>
</compile_context>

<pallas_src>
import functools

import numpy as np
import jax
import jax.numpy as jnp
from jax.experimental import pallas as pl
from jax.experimental.pallas import tpu as pltpu


# ----------------------------------------------------------------------------
# Band quantization (pure numpy, identical to the PyTorch helper)
# ----------------------------------------------------------------------------
def _quantize_hz2bins(sr, n_fft, bands, num_subbands):
    assert len(bands) + 1 == len(num_subbands)
    bands = [0] + list(bands) + [int(sr / 2)]
    bands = np.array(bands) * n_fft / sr
    freq_bins = []
    for i in range(len(num_subbands)):
        start_freq = int(bands[i])
        end_freq = int(bands[i + 1])
        nb = num_subbands[i]
        interval = (end_freq - start_freq) / nb
        for n in range(nb):
            freq_bins.append(int(start_freq + interval * n))
    freq_bins.append(int(n_fft / 2) + 1)
    return freq_bins


def _round_up(x, m):
    return ((x + m - 1) // m) * m


def _vmem_limit_bytes():
    """Generation-aware scoped-VMEM request (v5e/v6e: 128 MiB phys, v7x: 64 MiB)."""
    cap = 64 * 1024 * 1024
    try:
        info = pltpu.get_tpu_info()
        cap = int(getattr(info, "vmem_capacity_bytes", cap))
    except Exception:
        pass
    return max(16 * 1024 * 1024, min(int(cap * 0.45), 64 * 1024 * 1024))


def _pick_row_tile(R, in_cols, out_cols, in_itemsize, out_itemsize,
                   weight_bytes, vmem_limit):
    """Largest row tile whose double-buffered in+out blocks fit the VMEM budget,
    capped so the grid has >= 2 steps (v7x has 2 TensorCores)."""
    budget = int(vmem_limit * 0.6) - weight_bytes
    cap = max(8, _round_up(-(-R // 2), 8))
    for rt in (1024, 512, 256, 128, 64, 32, 16, 8):
        if rt > cap:
            continue
        per_step = 2 * rt * (in_cols * in_itemsize + out_cols * out_itemsize)
        if per_step <= budget:
            return rt
    return 8


# ----------------------------------------------------------------------------
# Fused kernel: per band, LayerNorm (one-pass stats over the true width) and
# Linear(D_i -> N), gamma/beta pre-folded into W/b.  Each band reads its own
# 128-aligned column slice of the repacked slab and (when N % 128 == 0) writes
# directly into its own lane-aligned output columns.
# ----------------------------------------------------------------------------
def _bandsplit_kernel(x_ref, *refs, band_meta, eps, n_out, store_per_band):
    o_ref = refs[-1]
    p_refs = refs[:-1]                               # 2 refs per band: W_eff, b_eff
    outs = []
    for i, (c0, dpad, d_true) in enumerate(band_meta):
        w_ref = p_refs[2 * i]
        b_ref = p_refs[2 * i + 1]
        # Aligned per-band load (c0, dpad are multiples of 128); only this band
        # is live at a time.
        xb = x_ref[:, c0:c0 + dpad].astype(jnp.float32)        # (TR, dpad)
        inv_d = 1.0 / float(d_true)
        s = jnp.sum(xb, axis=-1, keepdims=True)
        sq = jnp.sum(xb * xb, axis=-1, keepdims=True)
        mean = s * inv_d
        var = jnp.maximum(sq * inv_d - mean * mean, 0.0)       # padded cols are 0
        xhat = (xb - mean) * jax.lax.rsqrt(var + eps)
        xhat = xhat.astype(w_ref.dtype)
        # K = dpad (>=128, 128-aligned); zero-padded W rows kill the pad columns.
        y = jnp.dot(xhat, w_ref[...], preferred_element_type=jnp.float32)
        y = y + b_ref[...]
        if store_per_band:
            o_ref[:, i * n_out:(i + 1) * n_out] = y.astype(o_ref.dtype)
        else:
            outs.append(y)
    if not store_per_band:
        o_ref[...] = jnp.concatenate(outs, axis=-1).astype(o_ref.dtype)


# ----------------------------------------------------------------------------
# Parameter init (synthetic but non-trivial, so the LN affine path is tested)
# ----------------------------------------------------------------------------
def init_bandsplit_params(key, band_intervals, channels, fc_dim):
    params = []
    n_out = channels * fc_dim
    for bi in band_intervals:
        d_in = 2 * channels * int(bi)
        key, kg, kbe, kw, kb = jax.random.split(key, 5)
        bound = 1.0 / np.sqrt(d_in)
        gamma = jax.random.uniform(kg, (1, d_in), jnp.float32, 0.5, 1.5)
        beta = jax.random.uniform(kbe, (1, d_in), jnp.float32, -0.1, 0.1)
        w = jax.random.uniform(kw, (d_in, n_out), jnp.float32, -bound, bound)
        b = jax.random.uniform(kb, (1, n_out), jnp.float32, -bound, bound)
        params.append((gamma, beta, w, b))
    return params


# ----------------------------------------------------------------------------
# Forward wrapper
# ----------------------------------------------------------------------------
def bandsplit_forward(cspec, bands, params, channels, fc_dim, *, row_tile=None,
                      eps=1e-5, use_bf16=True, out_dtype=None):
    """cspec: (B, F, T, 2*channels) -> (B, channels*fc_dim, num_bands, T)."""
    B, F, T, C = cspec.shape
    assert C == 2 * channels
    N = channels * fc_dim
    nb = len(bands) - 1
    R = B * T
    out_dtype = cspec.dtype if out_dtype is None else out_dtype
    in_dtype = jnp.bfloat16 if use_bf16 else jnp.float32

    # Static per-band column ranges in the (f c)-flattened slab, padded so each
    # band starts on a 128-lane boundary.
    col_ranges = [(int(bands[i]) * C, int(bands[i + 1]) * C) for i in range(nb)]
    widths = [c1 - c0 for c0, c1 in col_ranges]
    pad_widths = [_round_up(d, 128) for d in widths]
    offsets = np.concatenate([[0], np.cumsum(pad_widths)[:-1]])
    w_rep = int(np.sum(pad_widths))
    band_meta = tuple((int(offsets[i]), int(pad_widths[i]), int(widths[i]))
                      for i in range(nb))

    # Single hoisted layout op: 'b f t c -> (b t)(f c)' with band columns
    # repacked onto 128-lane boundaries (zero fill), cast to bf16.
    # TODO(synk): the input transpose and this repack stay in XLA; fusing them
    # into the producer (STFT) would remove one more HBM round trip.
    x_t = jnp.transpose(cspec, (0, 2, 1, 3)).reshape(R, F * C)
    pieces = []
    for (c0, c1), dpad in zip(col_ranges, pad_widths):
        piece = x_t[:, c0:c1]
        if dpad > (c1 - c0):
            piece = jnp.pad(piece, ((0, 0), (0, dpad - (c1 - c0))))
        pieces.append(piece)
    x2d = jnp.concatenate(pieces, axis=1).astype(in_dtype)      # (R, w_rep)

    # Host-side param prep: fold gamma into W, beta into the bias, zero-pad W
    # rows to the 128-aligned band width, bf16 weights.
    resident = lambda i: (0, 0)
    flat_params = []
    param_specs = []
    weight_bytes = 0
    for (gamma, beta, w, b), (c0, dpad, d) in zip(params, band_meta):
        w_eff = w * gamma.reshape(-1, 1)                         # (d, N) f32
        b_eff = (beta @ w + b).astype(jnp.float32)               # (1, N) f32
        if dpad > d:
            w_eff = jnp.pad(w_eff, ((0, dpad - d), (0, 0)))
        w_eff = w_eff.astype(in_dtype)
        flat_params += [w_eff, b_eff]
        param_specs += [pl.BlockSpec(w_eff.shape, resident),
                        pl.BlockSpec(b_eff.shape, resident)]
        weight_bytes += dpad * N * jnp.dtype(in_dtype).itemsize + N * 4

    vmem_limit = _vmem_limit_bytes()
    if row_tile is None:
        row_tile = _pick_row_tile(R, w_rep, nb * N,
                                  jnp.dtype(in_dtype).itemsize,
                                  jnp.dtype(out_dtype).itemsize,
                                  weight_bytes, vmem_limit)

    store_per_band = (N % 128 == 0)     # real config N=256 -> unmasked stores
    kernel = functools.partial(_bandsplit_kernel, band_meta=band_meta, eps=eps,
                               n_out=N, store_per_band=store_per_band)

    y = pl.pallas_call(
        kernel,
        out_shape=jax.ShapeDtypeStruct((R, nb * N), out_dtype),
        grid=(pl.cdiv(R, row_tile),),
        in_specs=[pl.BlockSpec((row_tile, w_rep), lambda i: (i, 0))] + param_specs,
        out_specs=pl.BlockSpec((row_tile, nb * N), lambda i: (i, 0)),
        compiler_params=pltpu.CompilerParams(
            dimension_semantics=("parallel",),
            vmem_limit_bytes=vmem_limit,
        ),
    )(x2d, *flat_params)

    # (B*T, nb*N) -> (B, N, nb, T)   == torch.cat([... 'b t n -> b n 1 t'], dim=-2)
    # TODO(synk): final layout shuffle left to XLA; emit T-as-lanes from the
    # kernel or let the consumer accept (B, T, nb, N) to drop this pass.
    y = y.reshape(B, T, nb, N)
    return jnp.transpose(y, (0, 3, 2, 1))


# ----------------------------------------------------------------------------
# Pure-JAX reference (mirrors the PyTorch module; input/matmul precision
# mirrors the kernel so the comparison is apples-to-apples).
# ----------------------------------------------------------------------------
def bandsplit_reference(cspec, bands, params, channels, fc_dim, *, eps=1e-5,
                        use_bf16=True):
    B, F, T, C = cspec.shape
    x = cspec
    if use_bf16:
        x = x.astype(jnp.bfloat16).astype(jnp.float32)
    outs = []
    for i in range(len(bands) - 1):
        s, e = int(bands[i]), int(bands[i + 1])
        xb = jnp.transpose(x[:, s:e], (0, 2, 1, 3)).reshape(B, T, (e - s) * C)
        gamma, beta, w, b = params[i]
        mean = jnp.mean(xb, axis=-1, keepdims=True)
        xc = xb - mean
        var = jnp.mean(xc * xc, axis=-1, keepdims=True)
        xn = xc * jax.lax.rsqrt(var + eps) * gamma[0] + beta[0]
        if use_bf16:
            y = jnp.dot(xn.astype(jnp.bfloat16), w.astype(jnp.bfloat16),
                        preferred_element_type=jnp.float32) + b[0]
        else:
            y = xn @ w + b[0]
        outs.append(jnp.transpose(y, (0, 2, 1))[:, :, None, :])
    return jnp.concatenate(outs, axis=-2)


if __name__ == "__main__":
    # Small config (scaled down from the defaults so shapes stay tiny).
    sr, n_fft = 16000, 64
    channels, fc_dim = 2, 16
    bands_hz = [2000, 4000]
    num_subbands = [2, 2, 1]

    bands = np.array(_quantize_hz2bins(sr, n_fft, bands_hz, num_subbands))
    assert len(bands) == sum(num_subbands) + 1
    band_intervals = bands[1:] - bands[:-1]          # [4, 4, 4, 4, 17]

    B, T = 2, 8
    F = n_fft // 2 + 1                               # 33
    C = 2 * channels                                 # 4

    key = jax.random.PRNGKey(0)
    key, kx = jax.random.split(key)
    cspec = jax.random.normal(kx, (B, F, T, C), jnp.float32)

    params = init_bandsplit_params(key, band_intervals, channels, fc_dim)

    out = bandsplit_forward(cspec, bands, params, channels, fc_dim)
    out = jax.block_until_ready(out)

    expected_shape = (B, channels * fc_dim, len(band_intervals), T)
    assert out.shape == expected_shape, (out.shape, expected_shape)

    ref = bandsplit_reference(cspec, bands, params, channels, fc_dim)
    np.testing.assert_allclose(np.asarray(out), np.asarray(ref),
                               rtol=2e-2, atol=2e-2)

    print("KERNEL_OK")
</pallas_src>

<mosaic_0001>
module attributes {stable_mosaic.version = 11 : i64} {
  func.func @_bandsplit_kernel(%arg0: i32, %arg1: memref<8x640xbf16, #tpu.memory_space<vmem>>, %arg2: memref<128x32xbf16, #tpu.memory_space<vmem>>, %arg3: memref<1x32xf32, #tpu.memory_space<vmem>>, %arg4: memref<128x32xbf16, #tpu.memory_space<vmem>>, %arg5: memref<1x32xf32, #tpu.memory_space<vmem>>, %arg6: memref<128x32xbf16, #tpu.memory_space<vmem>>, %arg7: memref<1x32xf32, #tpu.memory_space<vmem>>, %arg8: memref<128x32xbf16, #tpu.memory_space<vmem>>, %arg9: memref<1x32xf32, #tpu.memory_space<vmem>>, %arg10: memref<128x32xbf16, #tpu.memory_space<vmem>>, %arg11: memref<1x32xf32, #tpu.memory_space<vmem>>, %arg12: memref<8x160xf32, #tpu.memory_space<vmem>>) attributes {dimension_semantics = [#tpu.dimension_semantics<parallel>], iteration_bounds = array<i64: 2>, scalar_prefetch = 0 : i64, scratch_operands = 0 : i64, tpu.core_type = #tpu.core_type<tc>, window_params = [{transform_indices = @transform_0, window_bounds = array<i64: 8, 640>}, {pipeline_mode = #tpu.pipeline_mode<synchronous>, transform_indices = @transform_1, window_bounds = array<i64: 128, 32>}, {pipeline_mode = #tpu.pipeline_mode<synchronous>, transform_indices = @transform_2, window_bounds = array<i64: 1, 32>}, {pipeline_mode = #tpu.pipeline_mode<synchronous>, transform_indices = @transform_3, window_bounds = array<i64: 128, 32>}, {pipeline_mode = #tpu.pipeline_mode<synchronous>, transform_indices = @transform_4, window_bounds = array<i64: 1, 32>}, {pipeline_mode = #tpu.pipeline_mode<synchronous>, transform_indices = @transform_5, window_bounds = array<i64: 128, 32>}, {pipeline_mode = #tpu.pipeline_mode<synchronous>, transform_indices = @transform_6, window_bounds = array<i64: 1, 32>}, {pipeline_mode = #tpu.pipeline_mode<synchronous>, transform_indices = @transform_7, window_bounds = array<i64: 128, 32>}, {pipeline_mode = #tpu.pipeline_mode<synchronous>, transform_indices = @transform_8, window_bounds = array<i64: 1, 32>}, {pipeline_mode = #tpu.pipeline_mode<synchronous>, transform_indices = @transform_9, window_bounds = array<i64: 128, 32>}, {pipeline_mode = #tpu.pipeline_mode<synchronous>, transform_indices = @transform_10, window_bounds = array<i64: 1, 32>}, {transform_indices = @transform_11, window_bounds = array<i64: 8, 160>}]} {
    %c0 = arith.constant 0 : index
    %c0_0 = arith.constant 0 : index
    %0 = vector.load %arg1[%c0, %c0_0] : memref<8x640xbf16, #tpu.memory_space<vmem>>, vector<8x128xbf16>
    %1 = arith.extf %0 : vector<8x128xbf16> to vector<8x128xf32>
    %cst = arith.constant dense<0.000000e+00> : vector<8xf32>
    %2 = vector.multi_reduction <add>, %1, %cst [1] : vector<8x128xf32> to vector<8xf32>
    %3 = vector.shape_cast %2 : vector<8xf32> to vector<8x1xf32>
    %4 = arith.mulf %1, %1 : vector<8x128xf32>
    %cst_1 = arith.constant dense<0.000000e+00> : vector<8xf32>
    %5 = vector.multi_reduction <add>, %4, %cst_1 [1] : vector<8x128xf32> to vector<8xf32>
    %6 = vector.shape_cast %5 : vector<8xf32> to vector<8x1xf32>
    %cst_2 = arith.constant 6.250000e-02 : f32
    %7 = vector.broadcast %cst_2 : f32 to vector<8x1xf32>
    %8 = arith.mulf %3, %7 : vector<8x1xf32>
    %cst_3 = arith.constant 6.250000e-02 : f32
    %9 = vector.broadcast %cst_3 : f32 to vector<8x1xf32>
    %10 = arith.mulf %6, %9 : vector<8x1xf32>
    %11 = arith.mulf %8, %8 : vector<8x1xf32>
    %12 = arith.subf %10, %11 : vector<8x1xf32>
    %cst_4 = arith.constant 0.000000e+00 : f32
    %13 = vector.broadcast %cst_4 : f32 to vector<8x1xf32>
    %14 = arith.maximumf %12, %13 : vector<8x1xf32>
    %15 = vector.broadcast %8 : vector<8x1xf32> to vector<8x128xf32>
    %16 = arith.subf %1, %15 : vector<8x128xf32>
    %cst_5 = arith.constant 9.99999974E-6 : f32
    %17 = vector.broadcast %cst_5 : f32 to vector<8x1xf32>
    %18 = arith.addf %14, %17 : vector<8x1xf32>
    %19 = math.rsqrt %18 : vector<8x1xf32>
    %20 = vector.broadcast %19 : vector<8x1xf32> to vector<8x128xf32>
    %21 = arith.mulf %16, %20 : vector<8x128xf32>
    %22 = arith.truncf %21 : vector<8x128xf32> to vector<8x128xbf16>
    %c0_6 = arith.constant 0 : index
    %c0_7 = arith.constant 0 : index
    %23 = vector.load %arg2[%c0_6, %c0_7] : memref<128x32xbf16, #tpu.memory_space<vmem>>, vector<128x32xbf16>
    %cst_8 = arith.constant dense<0.000000e+00> : vector<8x32xf32>
    %24 = tpu.matmul %22, %23, %cst_8 {dimension_numbers = #tpu.dot_dimension_numbers<[1], [0], [0], [1], [0, 0, 1, 1], [], []>} : vector<8x128xbf16>, vector<128x32xbf16>, vector<8x32xf32> -> vector<8x32xf32>
    %c0_9 = arith.constant 0 : index
    %c0_10 = arith.constant 0 : index
    %25 = vector.load %arg3[%c0_9, %c0_10] : memref<1x32xf32, #tpu.memory_space<vmem>>, vector<1x32xf32>
    %26 = vector.broadcast %25 : vector<1x32xf32> to vector<8x32xf32>
    %27 = arith.addf %24, %26 : vector<8x32xf32>
    %c0_11 = arith.constant 0 : index
    %c128 = arith.constant 128 : index
    %28 = vector.load %arg1[%c0_11, %c128] : memref<8x640xbf16, #tpu.memory_space<vmem>>, vector<8x128xbf16>
    %29 = arith.extf %28 : vector<8x128xbf16> to vector<8x128xf32>
    %cst_12 = arith.constant dense<0.000000e+00> : vector<8xf32>
    %30 = vector.multi_reduction <add>, %29, %cst_12 [1] : vector<8x128xf32> to vector<8xf32>
    %31 = vector.shape_cast %30 : vector<8xf32> to vector<8x1xf32>
    %32 = arith.mulf %29, %29 : vector<8x128xf32>
    %cst_13 = arith.constant dense<0.000000e+00> : vector<8xf32>
    %33 = vector.multi_reduction <add>, %32, %cst_13 [1] : vector<8x128xf32> to vector<8xf32>
    %34 = vector.shape_cast %33 : vector<8xf32> to vector<8x1xf32>
    %cst_14 = arith.constant 6.250000e-02 : f32
    %35 = vector.broadcast %cst_14 : f32 to vector<8x1xf32>
    %36 = arith.mulf %31, %35 : vector<8x1xf32>
    %cst_15 = arith.constant 6.250000e-02 : f32
    %37 = vector.broadcast %cst_15 : f32 to vector<8x1xf32>
    %38 = arith.mulf %34, %37 : vector<8x1xf32>
    %39 = arith.mulf %36, %36 : vector<8x1xf32>
    %40 = arith.subf %38, %39 : vector<8x1xf32>
    %cst_16 = arith.constant 0.000000e+00 : f32
    %41 = vector.broadcast %cst_16 : f32 to vector<8x1xf32>
    %42 = arith.maximumf %40, %41 : vector<8x1xf32>
    %43 = vector.broadcast %36 : vector<8x1xf32> to vector<8x128xf32>
    %44 = arith.subf %29, %43 : vector<8x128xf32>
    %cst_17 = arith.constant 9.99999974E-6 : f32
    %45 = vector.broadcast %cst_17 : f32 to vector<8x1xf32>
    %46 = arith.addf %42, %45 : vector<8x1xf32>
    %47 = math.rsqrt %46 : vector<8x1xf32>
    %48 = vector.broadcast %47 : vector<8x1xf32> to vector<8x128xf32>
    %49 = arith.mulf %44, %48 : vector<8x128xf32>
    %50 = arith.truncf %49 : vector<8x128xf32> to vector<8x128xbf16>
    %c0_18 = arith.constant 0 : index
    %c0_19 = arith.constant 0 : index
    %51 = vector.load %arg4[%c0_18, %c0_19] : memref<128x32xbf16, #tpu.memory_space<vmem>>, vector<128x32xbf16>
    %cst_20 = arith.constant dense<0.000000e+00> : vector<8x32xf32>
    %52 = tpu.matmul %50, %51, %cst_20 {dimension_numbers = #tpu.dot_dimension_numbers<[1], [0], [0], [1], [0, 0, 1, 1], [], []>} : vector<8x128xbf16>, vector<128x32xbf16>, vector<8x32xf32> -> vector<8x32xf32>
    %c0_21 = arith.constant 0 : index
    %c0_22 = arith.constant 0 : index
    %53 = vector.load %arg5[%c0_21, %c0_22] : memref<1x32xf32, #tpu.memory_space<vmem>>, vector<1x32xf32>
    %54 = vector.broadcast %53 : vector<1x32xf32> to vector<8x32xf32>
    %55 = arith.addf %52, %54 : vector<8x32xf32>
    %c0_23 = arith.constant 0 : index
    %c256 = arith.constant 256 : index
    %56 = vector.load %arg1[%c0_23, %c256] : memref<8x640xbf16, #tpu.memory_space<vmem>>, vector<8x128xbf16>
    %57 = arith.extf %56 : vector<8x128xbf16> to vector<8x128xf32>
    %cst_24 = arith.constant dense<0.000000e+00> : vector<8xf32>
    %58 = vector.multi_reduction <add>, %57, %cst_24 [1] : vector<8x128xf32> to vector<8xf32>
    %59 = vector.shape_cast %58 : vector<8xf32> to vector<8x1xf32>
    %60 = arith.mulf %57, %57 : vector<8x128xf32>
    %cst_25 = arith.constant dense<0.000000e+00> : vector<8xf32>
    %61 = vector.multi_reduction <add>, %60, %cst_25 [1] : vector<8x128xf32> to vector<8xf32>
    %62 = vector.shape_cast %61 : vector<8xf32> to vector<8x1xf32>
    %cst_26 = arith.constant 6.250000e-02 : f32
    %63 = vector.broadcast %cst_26 : f32 to vector<8x1xf32>
    %64 = arith.mulf %59, %63 : vector<8x1xf32>
    %cst_27 = arith.constant 6.250000e-02 : f32
    %65 = vector.broadcast %cst_27 : f32 to vector<8x1xf32>
    %66 = arith.mulf %62, %65 : vector<8x1xf32>
    %67 = arith.mulf %64, %64 : vector<8x1xf32>
    %68 = arith.subf %66, %67 : vector<8x1xf32>
    %cst_28 = arith.constant 0.000000e+00 : f32
    %69 = vector.broadcast %cst_28 : f32 to vector<8x1xf32>
    %70 = arith.maximumf %68, %69 : vector<8x1xf32>
    %71 = vector.broadcast %64 : vector<8x1xf32> to vector<8x128xf32>
    %72 = arith.subf %57, %71 : vector<8x128xf32>
    %cst_29 = arith.constant 9.99999974E-6 : f32
    %73 = vector.broadcast %cst_29 : f32 to vector<8x1xf32>
    %74 = arith.addf %70, %73 : vector<8x1xf32>
    %75 = math.rsqrt %74 : vector<8x1xf32>
    %76 = vector.broadcast %75 : vector<8x1xf32> to vector<8x128xf32>
    %77 = arith.mulf %72, %76 : vector<8x128xf32>
    %78 = arith.truncf %77 : vector<8x128xf32> to vector<8x128xbf16>
    %c0_30 = arith.constant 0 : index
    %c0_31 = arith.constant 0 : index
    %79 = vector.load %arg6[%c0_30, %c0_31] : memref<128x32xbf16, #tpu.memory_space<vmem>>, vector<128x32xbf16>
    %cst_32 = arith.constant dense<0.000000e+00> : vector<8x32xf32>
    %80 = tpu.matmul %78, %79, %cst_32 {dimension_numbers = #tpu.dot_dimension_numbers<[1], [0], [0], [1], [0, 0, 1, 1], [], []>} : vector<8x128xbf16>, vector<128x32xbf16>, vector<8x32xf32> -> vector<8x32xf32>
    %c0_33 = arith.constant 0 : index
    %c0_34 = arith.constant 0 : index
    %81 = vector.load %arg7[%c0_33, %c0_34] : memref<1x32xf32, #tpu.memory_space<vmem>>, vector<1x32xf32>
    %82 = vector.broadcast %81 : vector<1x32xf32> to vector<8x32xf32>
    %83 = arith.addf %80, %82 : vector<8x32xf32>
    %c0_35 = arith.constant 0 : index
    %c384 = arith.constant 384 : index
    %84 = vector.load %arg1[%c0_35, %c384] : memref<8x640xbf16, #tpu.memory_space<vmem>>, vector<8x128xbf16>
    %85 = arith.extf %84 : vector<8x128xbf16> to vector<8x128xf32>
    %cst_36 = arith.constant dense<0.000000e+00> : vector<8xf32>
    %86 = vector.multi_reduction <add>, %85, %cst_36 [1] : vector<8x128xf32> to vector<8xf32>
    %87 = vector.shape_cast %86 : vector<8xf32> to vector<8x1xf32>
    %88 = arith.mulf %85, %85 : vector<8x128xf32>
    %cst_37 = arith.constant dense<0.000000e+00> : vector<8xf32>
    %89 = vector.multi_reduction <add>, %88, %cst_37 [1] : vector<8x128xf32> to vector<8xf32>
    %90 = vector.shape_cast %89 : vector<8xf32> to vector<8x1xf32>
    %cst_38 = arith.constant 6.250000e-02 : f32
    %91 = vector.broadcast %cst_38 : f32 to vector<8x1xf32>
    %92 = arith.mulf %87, %91 : vector<8x1xf32>
    %cst_39 = arith.constant 6.250000e-02 : f32
    %93 = vector.broadcast %cst_39 : f32 to vector<8x1xf32>
    %94 = arith.mulf %90, %93 : vector<8x1xf32>
    %95 = arith.mulf %92, %92 : vector<8x1xf32>
    %96 = arith.subf %94, %95 : vector<8x1xf32>
    %cst_40 = arith.constant 0.000000e+00 : f32
    %97 = vector.broadcast %cst_40 : f32 to vector<8x1xf32>
    %98 = arith.maximumf %96, %97 : vector<8x1xf32>
    %99 = vector.broadcast %92 : vector<8x1xf32> to vector<8x128xf32>
    %100 = arith.subf %85, %99 : vector<8x128xf32>
    %cst_41 = arith.constant 9.99999974E-6 : f32
    %101 = vector.broadcast %cst_41 : f32 to vector<8x1xf32>
    %102 = arith.addf %98, %101 : vector<8x1xf32>
    %103 = math.rsqrt %102 : vector<8x1xf32>
    %104 = vector.broadcast %103 : vector<8x1xf32> to vector<8x128xf32>
    %105 = arith.mulf %100, %104 : vector<8x128xf32>
    %106 = arith.truncf %105 : vector<8x128xf32> to vector<8x128xbf16>
    %c0_42 = arith.constant 0 : index
    %c0_43 = arith.constant 0 : index
    %107 = vector.load %arg8[%c0_42, %c0_43] : memref<128x32xbf16, #tpu.memory_space<vmem>>, vector<128x32xbf16>
    %cst_44 = arith.constant dense<0.000000e+00> : vector<8x32xf32>
    %108 = tpu.matmul %106, %107, %cst_44 {dimension_numbers = #tpu.dot_dimension_numbers<[1], [0], [0], [1], [0, 0, 1, 1], [], []>} : vector<8x128xbf16>, vector<128x32xbf16>, vector<8x32xf32> -> vector<8x32xf32>
    %c0_45 = arith.constant 0 : index
    %c0_46 = arith.constant 0 : index
    %109 = vector.load %arg9[%c0_45, %c0_46] : memref<1x32xf32, #tpu.memory_space<vmem>>, vector<1x32xf32>
    %110 = vector.broadcast %109 : vector<1x32xf32> to vector<8x32xf32>
    %111 = arith.addf %108, %110 : vector<8x32xf32>
    %c0_47 = arith.constant 0 : index
    %c512 = arith.constant 512 : index
    %112 = vector.load %arg1[%c0_47, %c512] : memref<8x640xbf16, #tpu.memory_space<vmem>>, vector<8x128xbf16>
    %113 = arith.extf %112 : vector<8x128xbf16> to vector<8x128xf32>
    %cst_48 = arith.constant dense<0.000000e+00> : vector<8xf32>
    %114 = vector.multi_reduction <add>, %113, %cst_48 [1] : vector<8x128xf32> to vector<8xf32>
    %115 = vector.shape_cast %114 : vector<8xf32> to vector<8x1xf32>
    %116 = arith.mulf %113, %113 : vector<8x128xf32>
    %cst_49 = arith.constant dense<0.000000e+00> : vector<8xf32>
    %117 = vector.multi_reduction <add>, %116, %cst_49 [1] : vector<8x128xf32> to vector<8xf32>
    %118 = vector.shape_cast %117 : vector<8xf32> to vector<8x1xf32>
    %cst_50 = arith.constant 0.0147058824 : f32
    %119 = vector.broadcast %cst_50 : f32 to vector<8x1xf32>
    %120 = arith.mulf %115, %119 : vector<8x1xf32>
    %cst_51 = arith.constant 0.0147058824 : f32
    %121 = vector.broadcast %cst_51 : f32 to vector<8x1xf32>
    %122 = arith.mulf %118, %121 : vector<8x1xf32>
    %123 = arith.mulf %120, %120 : vector<8x1xf32>
    %124 = arith.subf %122, %123 : vector<8x1xf32>
    %cst_52 = arith.constant 0.000000e+00 : f32
    %125 = vector.broadcast %cst_52 : f32 to vector<8x1xf32>
    %126 = arith.maximumf %124, %125 : vector<8x1xf32>
    %127 = vector.broadcast %120 : vector<8x1xf32> to vector<8x128xf32>
    %128 = arith.subf %113, %127 : vector<8x128xf32>
    %cst_53 = arith.constant 9.99999974E-6 : f32
    %129 = vector.broadcast %cst_53 : f32 to vector<8x1xf32>
    %130 = arith.addf %126, %129 : vector<8x1xf32>
    %131 = math.rsqrt %130 : vector<8x1xf32>
    %132 = vector.broadcast %131 : vector<8x1xf32> to vector<8x128xf32>
    %133 = arith.mulf %128, %132 : vector<8x128xf32>
    %134 = arith.truncf %133 : vector<8x128xf32> to vector<8x128xbf16>
    %c0_54 = arith.constant 0 : index
    %c0_55 = arith.constant 0 : index
    %135 = vector.load %arg10[%c0_54, %c0_55] : memref<128x32xbf16, #tpu.memory_space<vmem>>, vector<128x32xbf16>
    %cst_56 = arith.constant dense<0.000000e+00> : vector<8x32xf32>
    %136 = tpu.matmul %134, %135, %cst_56 {dimension_numbers = #tpu.dot_dimension_numbers<[1], [0], [0], [1], [0, 0, 1, 1], [], []>} : vector<8x128xbf16>, vector<128x32xbf16>, vector<8x32xf32> -> vector<8x32xf32>
    %c0_57 = arith.constant 0 : index
    %c0_58 = arith.constant 0 : index
    %137 = vector.load %arg11[%c0_57, %c0_58] : memref<1x32xf32, #tpu.memory_space<vmem>>, vector<1x32xf32>
    %138 = vector.broadcast %137 : vector<1x32xf32> to vector<8x32xf32>
    %139 = arith.addf %136, %138 : vector<8x32xf32>
    %140 = tpu.concatenate %27, %55, %83, %111, %139 in 1 : vector<8x32xf32>, vector<8x32xf32>, vector<8x32xf32>, vector<8x32xf32>, vector<8x32xf32> -> vector<8x160xf32>
    %c0_59 = arith.constant 0 : index
    %c0_60 = arith.constant 0 : index
    %141 = vector.load %arg12[%c0_59, %c0_60] : memref<8x160xf32, #tpu.memory_space<vmem>>, vector<8x160xf32>
    tpu.vector_store %arg12[%c0_59, %c0_60], %140 {strides = array<i32>} : memref<8x160xf32, #tpu.memory_space<vmem>>, vector<8x160xf32>,
    return
  }
  func.func @transform_0(%arg0: i32) -> (i32, i32) {
    %c0_i32 = arith.constant 0 : i32
    %c0_i32_0 = arith.constant 0 : i32
    return %arg0, %c0_i32 : i32, i32
  }
  func.func @transform_1(%arg0: i32) -> (i32, i32) {
    %c0_i32 = arith.constant 0 : i32
    %c0_i32_0 = arith.constant 0 : i32
    %c0_i32_1 = arith.constant 0 : i32
    return %c0_i32, %c0_i32_0 : i32, i32
  }
  func.func @transform_2(%arg0: i32) -> (i32, i32) {
    %c0_i32 = arith.constant 0 : i32
    %c0_i32_0 = arith.constant 0 : i32
    %c0_i32_1 = arith.constant 0 : i32
    return %c0_i32, %c0_i32_0 : i32, i32
  }
  func.func @transform_3(%arg0: i32) -> (i32, i32) {
    %c0_i32 = arith.constant 0 : i32
    %c0_i32_0 = arith.constant 0 : i32
    %c0_i32_1 = arith.constant 0 : i32
    return %c0_i32, %c0_i32_0 : i32, i32
  }
  func.func @transform_4(%arg0: i32) -> (i32, i32) {
    %c0_i32 = arith.constant 0 : i32
    %c0_i32_0 = arith.constant 0 : i32
    %c0_i32_1 = arith.constant 0 : i32
    return %c0_i32, %c0_i32_0 : i32, i32
  }
  func.func @transform_5(%arg0: i32) -> (i32, i32) {
    %c0_i32 = arith.constant 0 : i32
    %c0_i32_0 = arith.constant 0 : i32
    %c0_i32_1 = arith.constant 0 : i32
    return %c0_i32, %c0_i32_0 : i32, i32
  }
  func.func @transform_6(%arg0: i32) -> (i32, i32) {
    %c0_i32 = arith.constant 0 : i32
    %c0_i32_0 = arith.constant 0 : i32
    %c0_i32_1 = arith.constant 0 : i32
    return %c0_i32, %c0_i32_0 : i32, i32
  }
  func.func @transform_7(%arg0: i32) -> (i32, i32) {
    %c0_i32 = arith.constant 0 : i32
    %c0_i32_0 = arith.constant 0 : i32
    %c0_i32_1 = arith.constant 0 : i32
    return %c0_i32, %c0_i32_0 : i32, i32
  }
  func.func @transform_8(%arg0: i32) -> (i32, i32) {
    %c0_i32 = arith.constant 0 : i32
    %c0_i32_0 = arith.constant 0 : i32
    %c0_i32_1 = arith.constant 0 : i32
    return %c0_i32, %c0_i32_0 : i32, i32
  }
  func.func @transform_9(%arg0: i32) -> (i32, i32) {
    %c0_i32 = arith.constant 0 : i32
    %c0_i32_0 = arith.constant 0 : i32
    %c0_i32_1 = arith.constant 0 : i32
    return %c0_i32, %c0_i32_0 : i32, i32
  }
  func.func @transform_10(%arg0: i32) -> (i32, i32) {
    %c0_i32 = arith.constant 0 : i32
    %c0_i32_0 = arith.constant 0 : i32
    %c0_i32_1 = arith.constant 0 : i32
    return %c0_i32, %c0_i32_0 : i32, i32
  }
  func.func @transform_11(%arg0: i32) -> (i32, i32) {
    %c0_i32 = arith.constant 0 : i32
    %c0_i32_0 = arith.constant 0 : i32
    return %arg0, %c0_i32 : i32, i32
  }
}

</mosaic_0001>

<bundles_post_ra>
// kernel: tpu_custom_call.1
= control target key start
LH: loop header
LB: loop body
LE: loop exit
PB: predicated region body
PF: predicated region fallthrough
CT: control target
= control target key end

     0   :  { %s1688_s0 = inlined_call_operand.vmem [shape: bf16[16,640], index: 0, kind: input, shape index: {}]   ;;  %s1689_s1 = inlined_call_operand.vmem [shape: bf16[128,32], index: 1, kind: input, shape index: {}]   ;;  %s1690_s2 = inlined_call_operand.vmem [shape: f32[1,32], index: 2, kind: input, shape index: {}]   ;;  %s1691_s3 = inlined_call_operand.vmem [shape: bf16[128,32], index: 3, kind: input, shape index: {}]   ;;  %s1692_s4 = inlined_call_operand.vmem [shape: f32[1,32], index: 4, kind: input, shape index: {}]   ;;  %s1693_s5 = inlined_call_operand.vmem [shape: bf16[128,32], index: 5, kind: input, shape index: {}]   ;;  %s1694_s6 = inlined_call_operand.vmem [shape: f32[1,32], index: 6, kind: input, shape index: {}]   ;;  %s1695_s7 = inlined_call_operand.vmem [shape: bf16[128,32], index: 7, kind: input, shape index: {}]   ;;  %s1696_s8 = inlined_call_operand.vmem [shape: f32[1,32], index: 8, kind: input, shape index: {}]   ;;  %s1697_s9 = inlined_call_operand.vmem [shape: bf16[128,32], index: 9, kind: input, shape index: {}]   ;;  %s1698_s10 = inlined_call_operand.vmem [shape: f32[1,32], index: 10, kind: input, shape index: {}]   ;;  %s1699_s11 = inlined_call_operand.hbm [shape: f32[16,160], index: 11, kind: output, shape index: {}]  }
   0x1   :  { %1700 = sst [smem:[#allocation5_spill]] %s1688_s0 }
   0x2   :  { %16 = vsyncpa [#allocation3], 0 }
   0x3   :  { %18 = vsyncpa [#allocation3 + $0x1], 0  ;;  %s1413_s17 = smov 0   ;;  %s1415_s18 = smov 0  }
   0x4   :  { %s1417_s19 = smov 0   ;;  %s1419_s20 = smov 0  }
   0x5 LB: > { %s1434_s21 = sadd.s32 4294967295, %s1348_s20   ;;  %s1016_s22 = sadd.s32 4294967294, %s1348_s20   ;;  %s1348_s20 = sphi %s1419_s20, %s1707_s20   ;;  %s1344_s19 = sphi %s1417_s19, %s1706_s19   ;;  %s1340_s18 = sphi %s1415_s18, %s1705_s18   ;;  %s1336_s17 = sphi %s1413_s17, %s1704_s17  }
   0x6   : > { %s1438_s23 = sadd.s32 1, %s1348_s20   ;;  %s267_s24 = sadd.s32 1, %s1344_s19 }
   0x7   : > { %s264_s25 = ssub.s32 %s1348_s20, %s1438_s23  ;;  %p277_p0 = scmp.ne.s32.totalorder %s1344_s19, %s1340_s18 }
   0x8   : > { %p265_p1 = scmp.eq.s32.totalorder %s264_s25, 0  ;;  %p278_p2 = scmp.eq.s32.totalorder %s1434_s21, 1 }
   0x9   : > { %p283_p3 = scmp.ne.s32.totalorder %s1340_s18, %s1336_s17  ;;  %p284_p4 = scmp.eq.s32.totalorder %s1016_s22, 1 }
   0xa   : > { %s1449_s26 = scalar_select %p265_p1, %s1344_s19, %s267_s24  }
   0xb   : > { %p1451_p5 = por %p278_p2, %p277_p0  ;;  %p1455_p6 = por %p284_p4, %p283_p3 }
   0xc   : > { %p1019_p7 = scmp.ge.s32.totalorder %s1348_s20, 1  ;;  %p340_p8 = scmp.lt.s32.totalorder %s1348_s20, 3 }
   0xe   : > { %p341_p9 = pnand %p1019_p7, %p340_p8 }
   0xf   : > { %p380_p10 = scmp.lt.s32.totalorder (!%p341_p9), %s1434_s21, 1  ;;  %s1703_s0 = sld [smem:[#allocation5_spill]] (!%p341_p9) }
  0x10   : > { %344 = sbr.rel (%p341_p9) target bundleno = 438 (0x1b6), region = 64  ;;  %s1350_s25 = smov (!%p341_p9), 32  }
  0x11   : > { %s1352_s13 = smov (!%p341_p9), 96  }
  0x15   : > { %s381_s29 = scalar_select %p380_p10, %s1434_s21, 1  ;;  %v1210_v13 = vld [vmem:[%s1693_s5 + $0x38] sm:$0xff]  ;;  %v1209_v14 = vld [vmem:[%s1693_s5 + $0x30] sm:$0xff]  ;;  %v1208_v16 = vld [vmem:[%s1693_s5 + $0x28] sm:$0xff]  ;;  %vm932_vm15 = vcmask 261120  }
  0x16   : > { %693 = vmatpush.bf16.msra.mxu2 %v1210_v13  ;;  %v1202_v15 = vld [vmem:[%s1691_s3 + $0x38] sm:$0xff]  ;;  %v1201_v18 = vld [vmem:[%s1691_s3 + $0x30] sm:$0xff]  ;;  %v1207_v19 = vld [vmem:[%s1693_s5 + $0x20] sm:$0xff] }
  0x17   : > { %s1228_s30 = smul.u32 20, %s381_s29  ;;  %586 = vmatpush.bf16.msra.mxu1 %v1202_v15  ;;  %v1218_v17 = vld [vmem:[%s1695_s7 + $0x38] sm:$0xff]  ;;  %v1217_v20 = vld [vmem:[%s1695_s7 + $0x30] sm:$0xff]  ;;  %v1200_v21 = vld [vmem:[%s1691_s3 + $0x28] sm:$0xff]  ;;  %s1351_s29 = smov 64  }
  0x18   : > { %800 = vmatpush.bf16.msra.mxu3 %v1218_v17  ;;  %v1206_v22 = vld [vmem:[%s1693_s5 + $0x18] sm:$0xff]  ;;  %v1216_v23 = vld [vmem:[%s1695_s7 + $0x28] sm:$0xff]  ;;  %v1199_v24 = vld [vmem:[%s1691_s3 + $0x20] sm:$0xff] }
  0x19   : > { %s384_s14 = scalar_lea.vmem %s1703_s0, %s1228_s30  ;;  %v1205_v25 = vld [vmem:[%s1693_s5 + $0x10] sm:$0xff]  ;;  %v1215_v26 = vld [vmem:[%s1695_s7 + $0x20] sm:$0xff]  ;;  %v1198_v27 = vld [vmem:[%s1691_s3 + $0x18] sm:$0xff]  ;;  %s1227_s30 = sshll.u32 %s1434_s21, 4 }
  0x1a   : > { %v599_v0 = vld [vmem:[%s384_s14 + $0x8] sm:$0xff]   ;;  %v492_v1 = vld [vmem:[%s384_s14] sm:$0xff]   ;;  %v813_v8 = vld [vmem:[%s384_s14 + $0x10] sm:$0xf]  ;;  %694 = vmatpush.bf16.msra.mxu2 %v1209_v14  ;;  %s377_s14 = sand.u32 1, %s1340_s18   ;;  %s952_s0 = scalar_lea.hbm %s1699_s11, %s1227_s30 }
  0x1b   : > { %v1466_v2 = vunpack.c.l.bf16 %v599_v0  ;;  %v1468_v3 = vunpack.c.h.bf16 %v492_v1  ;;  %v1474_v5 = vunpack.c.h.bf16 %v599_v0  ;;  %v1481_v9 = vunpack.c.l.bf16 %v492_v1  ;;  %587 = vmatpush.bf16.msra.mxu1 %v1201_v18  ;;  %v1204_v28 = vld [vmem:[%s1693_s5 + $0x8] sm:$0xff]  ;;  %v1214_v29 = vld [vmem:[%s1695_s7 + $0x18] sm:$0xff]  ;;  %v1197_v30 = vld [vmem:[%s1691_s3 + $0x10] sm:$0xff]  ;;  %s1020_s22 = sshll.u32 %s377_s14, 4  ;;  %s956_s16 = sshll.u32 %s952_s0, 4  ;;  %s957_s16 = int_to_ptr.hbm [resolvable:$true] %s956_s16 }
  0x1c   : > { %v1483_v10 = vunpack.c.l.bf16 %v813_v8  ;;  %801 = vmatpush.bf16.msra.mxu3 %v1217_v20  ;;  %v1203_v31 = vld [vmem:[%s1693_s5] sm:$0xff]  ;;  %v1213_v32 = vld [vmem:[%s1695_s7 + $0x10] sm:$0xff]  ;;  %v1196_v33 = vld [vmem:[%s1691_s3 + $0x8] sm:$0xff]  ;;  %s379_s24 = scalar_lea.vmem [#allocation2], %s1020_s22  ;;  %s941_s21 = scalar_lea.sflag [#allocation3], %s377_s14 }
  0x1d   : > { %601 = vadd.xlane.f32.xlu0 %v1466_v2  ;;  %494 = vadd.xlane.f32.xlu2 %v1468_v3  ;;  %v603_v4 = vmul.f32 %v1466_v2, %v1466_v2  ;;  %v496_v6 = vmul.f32 %v1468_v3, %v1468_v3  ;;  %v710_v7 = vmul.f32 %v1474_v5, %v1474_v5  ;;  %v1212_v37 = vld [vmem:[%s1695_s7 + $0x8] sm:$0xff]  ;;  %v1195_v39 = vld [vmem:[%s1691_s3] sm:$0xff]  ;;  %v1194_v51 = vld [vmem:[%s1689_s1 + $0x38] sm:$0xff]  ;;  %s954_s15 = sshll.u32 %s379_s24, 4  ;;  %s1300_s22 = sshra.s32 %s957_s16, 4  ;;  %s955_s15 = int_to_ptr.vmem [resolvable:$true] %s954_s15  ;;  %s1301_s22 = int_to_ptr.hbm [resolvable:$true] %s1300_s22 }
  0x1e   : > { %v389_v11 = vmul.f32 %v1481_v9, %v1481_v9  ;;  %v817_v12 = vmul.f32 %v1483_v10, %v1483_v10  ;;  %695 = vmatpush.bf16.msra.mxu2 %v1208_v16  ;;  %v1211_v42 = vld [vmem:[%s1695_s7] sm:$0xff]  ;;  %479 = vmatpush.bf16.msra.mxu0 %v1194_v51  ;;  %v1193_v57 = vld [vmem:[%s1689_s1 + $0x30] sm:$0xff]  ;;  %v1192_v62 = vld [vmem:[%s1689_s1 + $0x28] sm:$0xff]  ;;  %s1306_s0 = scalar_lea.hbm %s1699_s11, 32  ;;  %p1307_p0 = scmp.lt.s32.totalorder %s1301_s22, %s1699_s11 }
  0x1f   : > { %604 = vadd.xlane.f32.xlu1 %v603_v4  ;;  %588 = vmatpush.bf16.msra.mxu1 %v1200_v21 }
  0x20   : > { %802 = vmatpush.bf16.msra.mxu3 %v1216_v23 }
  0x22   : > { %696 = vmatpush.bf16.msra.mxu2 %v1207_v19  ;;  %480 = vmatpush.bf16.msra.mxu0 %v1193_v57  ;;  %v1190_v19 = vld [vmem:[%s1689_s1 + $0x18] sm:$0xff] }
  0x23   : > { %589 = vmatpush.bf16.msra.mxu1 %v1199_v24 }
  0x24   : > { %803 = vmatpush.bf16.msra.mxu3 %v1215_v26 }
  0x25   : > { %708 = vadd.xlane.f32.xlu0 %v1474_v5  ;;  %497 = vadd.xlane.f32.xlu2 %v496_v6 }
  0x26   : > { %697 = vmatpush.bf16.msra.mxu2 %v1206_v22  ;;  %481 = vmatpush.bf16.msra.mxu0 %v1192_v62 }
  0x27   : > { %711 = vadd.xlane.f32.xlu1 %v710_v7  ;;  %590 = vmatpush.bf16.msra.mxu1 %v1198_v27 }
  0x28   : > { %804 = vmatpush.bf16.msra.mxu3 %v1214_v29 }
  0x2a   : > { %698 = vmatpush.bf16.msra.mxu2 %v1205_v25 }
  0x2b   : > { %591 = vmatpush.bf16.msra.mxu1 %v1197_v30 }
  0x2c   : > { %805 = vmatpush.bf16.msra.mxu3 %v1213_v32 }
  0x2d   : > { %387 = vadd.xlane.f32.xlu0 %v1481_v9  ;;  %815 = vadd.xlane.f32.xlu2 %v1483_v10 }
  0x2e   : > { %699 = vmatpush.bf16.msra.mxu2 %v1204_v28 }
  0x2f   : > { %390 = vadd.xlane.f32.xlu1 %v389_v11  ;;  %592 = vmatpush.bf16.msra.mxu1 %v1196_v33  ;;  %v1191_v11 = vld [vmem:[%s1689_s1 + $0x20] sm:$0xff] }
  0x30   : > { %806 = vmatpush.bf16.msra.mxu3 %v1212_v37  ;;  %482 = vmatpush.bf16.msra.mxu0 %v1191_v11  ;;  %v1223_v11 = vld [vmem:[%s1697_s9 + $0x20] sm:$0xff] }
  0x32   : > { %700 = vmatpush.bf16.msra.mxu2 %v1203_v31  ;;  %v1189_v31 = vld [vmem:[%s1689_s1 + $0x10] sm:$0xff] }
  0x33   : > { %593 = vmatpush.bf16.msra.mxu1 %v1195_v39 }
  0x34   : > { %807 = vmatpush.bf16.msra.mxu3 %v1211_v42  ;;  %483 = vmatpush.bf16.msra.mxu0 %v1190_v19 }
  0x35   : > { %818 = vadd.xlane.f32.xlu0 %v817_v12 }
  0x38   : > { %484 = vmatpush.bf16.msra.mxu0 %v1189_v31 }
  0x90   : > { %v602_v34 = vpop.xlane.xlu0 %601  ;;  %v495_v35 = vpop.xlane.xlu2 %494 }
  0x91   : > { %v1554_v36 = vmul.f32 0.0625, %v602_v34  ;;  %v1564_v41 = vmul.f32 0.0625, %v495_v35 }
  0x92   : > { %v605_v38 = vpop.xlane.xlu1 %604 }
  0x93   : > { %v608_v40 = vmul.f32 %v1554_v36, %v1554_v36  ;;  %v607_v43 = vmul.f32 0.0625, %v605_v38  ;;  %v501_v45 = vmul.f32 %v1564_v41, %v1564_v41  ;;  %v611_v33 = vsub.f32 %v1466_v2, %v1554_v36 }
  0x94   : > { %v504_v36 = vsub.f32 %v1468_v3, %v1564_v41  ;;  %v1226_v3 = vld [vmem:[%s1697_s9 + $0x38] sm:$0xff] }
  0x95   : > { %v609_v44 = vsub.f32 %v607_v43, %v608_v40  ;;  %v1188_v43 = vld [vmem:[%s1689_s1 + $0x8] sm:$0xff] }
  0x96   : > { %485 = vmatpush.bf16.msra.mxu0 %v1188_v43 }
  0x97   : > { %v610_v46 = vmax.f32 %v609_v44, 0.0 }
  0x98   : > { %v709_v47 = vpop.xlane.xlu0 %708  ;;  %v498_v48 = vpop.xlane.xlu2 %497 }
  0x99   : > { %v1571_v49 = vmul.f32 0.0625, %v709_v47  ;;  %v500_v50 = vmul.f32 0.0625, %v498_v48  ;;  %v612_v52 = vadd.f32 1e-05, %v610_v46 }
  0x9a   : > { %v712_v53 = vpop.xlane.xlu1 %711 }
  0x9b   : > { %v715_v54 = vmul.f32 %v1571_v49, %v1571_v49  ;;  %v502_v55 = vsub.f32 %v500_v50, %v501_v45  ;;  %v714_v56 = vmul.f32 0.0625, %v712_v53  ;;  %1276 = vrsqrt.f32 %v612_v52 }
  0x9c   : > { %vm619_vm1 = vweird.f32 %v612_v52  ;;  %v718_v51 = vsub.f32 %v1474_v5, %v1571_v49 }
  0x9d   : > { %v503_v58 = vmax.f32 %v502_v55, 0.0  ;;  %v716_v59 = vsub.f32 %v714_v56, %v715_v54  ;;  %v1187_v54 = vld [vmem:[%s1689_s1] sm:$0xff] }
  0x9e   : > { %486 = vmatpush.bf16.msra.mxu0 %v1187_v54 }
  0x9f   : > { %v505_v60 = vadd.f32 1e-05, %v503_v58  ;;  %v717_v61 = vmax.f32 %v716_v59, 0.0 }
  0xa0   : > { %v388_v63 = vpop.xlane.xlu0 %387  ;;  %v816_v0 = vpop.xlane.xlu2 %815 }
  0xa1   : > { %1278 = vrsqrt.f32 %v505_v60  ;;  %v719_v1 = vadd.f32 1e-05, %v717_v61  ;;  %v1584_v4 = vmul.f32 0.0625, %v388_v63  ;;  %v1277_v6 = vpop.eup %1276  ;;  %v1589_v12 = vmul.f32 0.014705882, %v816_v0 }
  0xa2   : > { %v391_v7 = vpop.xlane.xlu1 %390  ;;  %v614_v8 = vmul.f32 %v1277_v6, %v612_v52  ;;  %vm620_vm0 = vweird.f32 %v1277_v6  ;;  %vm512_vm4 = vweird.f32 %v505_v60  ;;  %907 = vmatpush.bf16.msrb.mxu0 %v1226_v3 }
  0xa3   : > { %1280 = vrsqrt.f32 %v719_v1  ;;  %v394_v13 = vmul.f32 %v1584_v4, %v1584_v4  ;;  %v393_v14 = vmul.f32 0.0625, %v391_v7  ;;  %v822_v20 = vmul.f32 %v1589_v12, %v1589_v12  ;;  %vm621_vm2 = vmor %vm619_vm1, %vm620_vm0 }
  0xa4   : > { %v615_v15 = vmul.f32 %v1277_v6, %v614_v8  ;;  %vm726_vm7 = vweird.f32 %v719_v1  ;;  %v397_v62 = vsub.f32 %v1481_v9, %v1584_v4  ;;  %v1222_v9 = vld [vmem:[%s1697_s9 + $0x18] sm:$0xff]  ;;  %v1221_v4 = vld [vmem:[%s1697_s9 + $0x10] sm:$0xff]  ;;  %vm934_vm0 = vcmask 523264  }
  0xa5   : > { %v395_v16 = vsub.f32 %v393_v14, %v394_v13  ;;  %vm936_vm1 = vcmask 785408  }
  0xa6   : > { %v616_v18 = vmul.f32 0.5, %v615_v15 }
  0xa7   : > { %v1279_v17 = vpop.eup %1278  ;;  %v396_v22 = vmax.f32 %v395_v16, 0.0  ;;  %v825_v16 = vsub.f32 %v1483_v10, %v1589_v12  ;;  %v1272_v10 = vld [vmem:[%s1694_s6] ss:$0 sm:$0xff] }
  0xa8   : > { %v507_v21 = vmul.f32 %v1279_v17, %v505_v60  ;;  %v819_v23 = vpop.xlane.xlu0 %818  ;;  %v617_v25 = vsub.f32 1.5, %v616_v18  ;;  %vm513_vm3 = vweird.f32 %v1279_v17  ;;  %v1225_v60 = vld [vmem:[%s1697_s9 + $0x30] sm:$0xff] }
  0xa9   : > { %v1281_v24 = vpop.eup %1280  ;;  %v821_v26 = vmul.f32 0.014705882, %v819_v23  ;;  %v398_v29 = vadd.f32 1e-05, %v396_v22  ;;  %vm514_vm6 = vmor %vm512_vm4, %vm513_vm3  ;;  %908 = vmatpush.bf16.msrb.mxu0 %v1225_v60  ;;  %v1271_v22 = vld [vmem:[%s1692_s4] ss:$0 sm:$0xff] }
  0xaa   : > { %v508_v27 = vmul.f32 %v1279_v17, %v507_v21  ;;  %v721_v28 = vmul.f32 %v1281_v24, %v719_v1  ;;  %v618_v30 = vmul.f32 %v1277_v6, %v617_v25  ;;  %vm727_vm5 = vweird.f32 %v1281_v24  ;;  %v1224_v1 = vld [vmem:[%s1697_s9 + $0x28] sm:$0xff] }
  0xab   : > { %v823_v32 = vsub.f32 %v821_v26, %v822_v20  ;;  %1282 = vrsqrt.f32 %v398_v29  ;;  %vm728_vm8 = vmor %vm726_vm7, %vm727_vm5  ;;  %vm405_vm9 = vweird.f32 %v398_v29  ;;  %v1219_v20 = vld [vmem:[%s1697_s9] sm:$0xff] }
  0xac   : > { %v722_v34 = vmul.f32 %v1281_v24, %v721_v28  ;;  %v509_v35 = vmul.f32 0.5, %v508_v27  ;;  %v622_v37 = vsel %vm621_vm2, %v1277_v6, %v618_v30  ;;  %v1273_v26 = vld [vmem:[%s1696_s8] ss:$0 sm:$0xff] }
  0xad   : > { %v824_v38 = vmax.f32 %v823_v32, 0.0  ;;  %v623_v39 = vmul.f32 %v622_v37, %v611_v33  ;;  %909 = vmatpush.bf16.msrb.mxu0 %v1224_v1  ;;  %v1275_v37 = vld [vmem:[%s1698_s10] ss:$0 sm:$0xff] }
  0xae   : > { %v510_v40 = vsub.f32 1.5, %v509_v35  ;;  %v723_v42 = vmul.f32 0.5, %v722_v34 }
  0xaf   : > { %v826_v44 = vadd.f32 1e-05, %v824_v38  ;;  %v624_v45 = vpack.c.bf16 %v623_v39, %v623_v39  ;;  %v1274_v39 = vld [vmem:[%s1690_s2] ss:$0 sm:$0xff] }
  0xb0   : > { %v511_v46 = vmul.f32 %v1279_v17, %v510_v40  ;;  %v724_v2 = vsub.f32 1.5, %v723_v42 }
  0xb1   : > { %1284 = vrsqrt.f32 %v826_v44  ;;  %v1283_v47 = vpop.eup %1282  ;;  %701 = vmatmul.bf16.vlgmr.msra.gmra.mxu2 %v624_v45  ;;  %910 = vmatpush.bf16.msrb.mxu0 %v1223_v11  ;;  %vm833_vm12 = vweird.f32 %v826_v44 }
  0xb2   : > { %v515_v48 = vsel %vm514_vm6, %v1279_v17, %v511_v46  ;;  %v725_v50 = vmul.f32 %v1281_v24, %v724_v2  ;;  %v400_v53 = vmul.f32 %v1283_v47, %v398_v29  ;;  %vm406_vm10 = vweird.f32 %v1283_v47  ;;  %v1220_v17 = vld [vmem:[%s1697_s9 + $0x8] sm:$0xff] }
  0xb3   : > { %v516_v52 = vmul.f32 %v515_v48, %v504_v36  ;;  %vm407_vm11 = vmor %vm405_vm9, %vm406_vm10 }
  0xb4   : > { %v729_v55 = vsel %vm728_vm8, %v1281_v24, %v725_v50  ;;  %v401_v57 = vmul.f32 %v1283_v47, %v400_v53 }
  0xb5   : > { %v517_v41 = vpack.c.bf16 %v516_v52, %v516_v52  ;;  %v730_v56 = vmul.f32 %v729_v55, %v718_v51  ;;  %911 = vmatpush.bf16.msrb.mxu0 %v1222_v9 }
  0xb6   : > { %v402_v5 = vmul.f32 0.5, %v401_v57 }
  0xb7   : > { %v1285_v58 = vpop.eup %1284  ;;  %594 = vmatmul.bf16.vlgmr.msra.gmra.mxu1 %v517_v41  ;;  %v731_v59 = vpack.c.bf16 %v730_v56, %v730_v56 }
  0xb8   : > { %v828_v49 = vmul.f32 %v1285_v58, %v826_v44  ;;  %v403_v61 = vsub.f32 1.5, %v402_v5  ;;  %vm834_vm13 = vweird.f32 %v1285_v58 }
  0xb9   : > { %808 = vmatmul.bf16.vlgmr.msra.gmra.mxu3 %v731_v59  ;;  %vm835_vm14 = vmor %vm833_vm12, %vm834_vm13  ;;  %912 = vmatpush.bf16.msrb.mxu0 %v1221_v4 }
  0xba   : > { %v404_v63 = vmul.f32 %v1283_v47, %v403_v61  ;;  %v829_v0 = vmul.f32 %v1285_v58, %v828_v49 }
  0xbc   : > { %v408_v6 = vsel %vm407_vm11, %v1283_v47, %v404_v63  ;;  %v830_v8 = vmul.f32 0.5, %v829_v0 }
  0xbd   : > { %v409_v7 = vmul.f32 %v408_v6, %v397_v62  ;;  %913 = vmatpush.bf16.msrb.mxu0 %v1220_v17 }
  0xbe   : > { %v831_v14 = vsub.f32 1.5, %v830_v8 }
  0xbf   : > { %v410_v13 = vpack.c.bf16 %v409_v7, %v409_v7 }
  0xc0   : > { %v832_v15 = vmul.f32 %v1285_v58, %v831_v14 }
  0xc1   : > { %487 = vmatmul.bf16.vlgmr.msra.gmra.mxu0 %v410_v13 }
  0xc2   : > { %v836_v18 = vsel %vm835_vm14, %v1285_v58, %v832_v15  ;;  %914 = vmatpush.bf16.msrb.mxu0 %v1219_v20 }
  0xc3   : > { %v837_v19 = vmul.f32 %v836_v18, %v825_v16 }
  0xc5   : > { %v838_v21 = vpack.c.bf16 %v837_v19, %v837_v19 }
  0xd1   : > { %915 = vmatmul.bf16.vlgmr.msrb.gmra.mxu0 %v838_v21 }
 0x134   : > { %v595_v12 = vpop.f32.mrf.mxu1  ;;  %v702_v24 = vpop.f32.mrf.mxu2 }
 0x135   : > { %v596_v23 = vadd.f32 %v1271_v22, %v595_v12  ;;  %v703_v25 = vadd.f32 %v1272_v10, %v702_v24 }
 0x137   : > { %921 = vrot.lane.b32.xlu1 %v596_v23, %s1350_s25  ;;  %925 = vrot.lane.b32.xlu2 %v703_v25, %s1351_s29  ;;  %s1302_s25 = scalar_lea.hbm %s1301_s22, 16 }
 0x138   : > { %p1303_p11 = scmp.ne.s32.totalorder %s1301_s22, %s1302_s25  ;;  %p1308_p1 = scmp.lt.s32.totalorder %s1306_s0, %s1302_s25 }
 0x13a   : > { %p1304_p12 = pnand %p1303_p11, %p1451_p5  ;;  %p1309_p2 = por %p1308_p1, %p1307_p0 }
 0x13c   : > { %v597_v27 = vpop.f32.mrf.mxu1  ;;  %v809_v28 = vpop.f32.mrf.mxu3  ;;  %p1305_p13 = pneg %p1304_p12 }
 0x13d   : > { %v704_v29 = vpop.f32.mrf.mxu2  ;;  %v810_v30 = vadd.f32 %v1273_v26, %v809_v28 }
 0x13e   : > { %v488_v31 = vpop.f32.mrf.mxu0  ;;  %p1310_p3 = pnand %p1309_p2, %p1305_p13 }
 0x13f   : > { %929 = vrot.lane.b32.xlu0 %v810_v30, %s1352_s13  ;;  %v489_v42 = vadd.f32 %v1274_v39, %v488_v31 }
 0x144   : > { %v811_v32 = vpop.f32.mrf.mxu3 }
 0x146   : > { %v490_v33 = vpop.f32.mrf.mxu0 }
 0x14e   : > { %v916_v34 = vpop.f32.mrf.mxu0 }
 0x14f   : > { %v917_v38 = vadd.f32 %v1275_v37, %v916_v34 }
 0x151   : > { %939 = vst.msk [vmem:[%s379_s24 + $0x8] sm:$0xff] %vm932_vm15, %v917_v38 }
 0x156   : > { %v918_v35 = vpop.f32.mrf.mxu0 }
 0x191   : > { %v926_v44 = vpop.permute.xlu2 %925 }
 0x1a9   : > { %v922_v40 = vpop.permute.xlu1 %921 }
 0x1aa   : > { %v933_v43 = vsel %vm932_vm15, %v489_v42, %v922_v40 }
 0x1ab   : > { %v935_v46 = vsel %vm934_vm0, %v933_v43, %v926_v44 }
 0x1b1   : > { %v930_v45 = vpop.permute.xlu0 %929 }
 0x1b2   : > { %v937_v2 = vsel %vm936_vm1, %v935_v46, %v930_v45 }
 0x1b3   : > { %938 = vst [vmem:[%s379_s24] sm:$0xff] %v937_v2 }
 0x1b4   : > { %1313 = shalt.err (!%p1310_p3)
}
 0x1b5   : > { %1229 = dma.vmem_to_hbm [thread:$0]  (%p1451_p5), %s955_s15, 256, %s957_s16, %s941_s21  }
 0x1b6 PF: > { %p1235_p4 = scmp.ge.s32.totalorder %s1348_s20, 2  ;;  %s968_s14 = sand.u32 1, %s1336_s17  }
 0x1b7   : > { %s969_s24 = scalar_lea.sflag [#allocation3], %s968_s14 }
 0x1b8   : > { %p1232_p7 = pnand %p1235_p4, %p1455_p6 }
 0x1ba   : > { %p1233_p8 = pneg %p1232_p7 }
 0x1bc   : > { %1331 = dma.done.wait (%p1233_p8), %s969_s24, 256  }
 0x1bd   : > { %1333 = vsyncadd (%p1233_p8), %s969_s24, 4294967040  ;;  %p21_p9 = scmp.ge.s32.totalorder %s1438_s23, 4   ;;  %s1704_s17 = smov %s1340_s18 }
 0x1be   : > { %s1705_s18 = smov %s1344_s19  ;;  %s1706_s19 = smov %s1449_s26 }
 0x1bf   : > { %s1707_s20 = smov %s1438_s23  ;;  %23 = sbr.rel (!%p21_p9) target bundleno = 5 (0x5), region = 99 }
 0x1c4   :  { %975 = vsyncpa [#allocation3], 1 }
 0x1c5   :  { %977 = vsyncpa [#allocation3 + $0x1], 1 }

</bundles_post_ra>
